<compile_context>
chip_gen: v7x
topology: tpu7x:2x2x1
jax: 0.10.0
libtpu: 0.0.40
codegen_flags: <defaults>
</compile_context>

<pallas_src>
import jax
import jax.numpy as jnp
import numpy as np
from jax.experimental import pallas as pl
from jax.experimental.pallas import tpu as pltpu

# Shapes implied by the module (PyTorch convention, NCHW input).
B = 2
CIN = 4
H = W = 16
COUT = 32
HP, WP = H // 2, W // 2              # 8, 8
HIDDEN = 128
NUM_CLASSES = 10
LOGITS_PAD = 128                     # lane-dense logits, sliced to 10 outside
FEAT = COUT * HP * WP                # 2048 == 128 * final_width(4) * final_height(4)
KROWS = 3 * (W + 2) * CIN            # 216: im2col contraction = (kh, padded_w, cin)
KP = 256                             # contraction zero-padded to 2x128 lanes
PCOLS = WP * COUT                    # 256: pooled lane layout = (wp, cout)
WLANES = 2 * PCOLS                   # 512: conv-weight lanes = (dw, wp, cout)
H1 = HP * HIDDEN                     # 1024: Linear1 output lanes = (hp, n)

TB = 8 if B % 8 == 0 else B          # batch tile per grid step
NB = B // TB                         # grid size over batch
RT = HP * TB                         # pooled rows per tile (row = hp*TB + b)
ROWS = 2 * RT                        # conv-LHS rows per tile (row = dh*RT + hp*TB + b)


def cnn_fused_kernel(xcols_ref, wconv_ref, bconv_ref, w1_ref, b1_ref,
                     w2_ref, b2_ref, out_ref):
    # xcols_ref : (ROWS, KP)      bf16  row = dh*RT + hp*TB + b
    # wconv_ref : (KP, WLANES)    bf16  lane = dw*PCOLS + wp*COUT + c
    # bconv_ref : (1, PCOLS)      f32   conv bias tiled over wp
    # w1_ref    : (PCOLS, H1)     bf16  Linear1, flatten permutation pre-folded
    # b1_ref    : (1, HIDDEN)     f32
    # w2_ref    : (HIDDEN, 128)   bf16  Linear2, zero-padded to 128 lanes
    # b2_ref    : (1, 128)        f32
    # out_ref   : (TB, 128)       f32

    # Conv for all four 2x2-pool phases in ONE MXU matmul (f32 accumulation).
    conv = jnp.dot(xcols_ref[...], wconv_ref[...],
                   preferred_element_type=jnp.float32)           # (ROWS, WLANES)

    # MaxPool2d(2,2) == element-wise max over the dh (row-half) / dw (lane-half)
    # phase quadrants; the shared bias + ReLU are applied once after the max
    # (bias is phase-invariant, ReLU is monotone).  All in f32 on the VPU.
    c00 = conv[:RT, :PCOLS]
    c01 = conv[:RT, PCOLS:]
    c10 = conv[RT:, :PCOLS]
    c11 = conv[RT:, PCOLS:]
    pre = jnp.maximum(jnp.maximum(c00, c01), jnp.maximum(c10, c11)) + bconv_ref[...]
    pool = jnp.maximum(pre, 0.0)                                 # (RT, PCOLS) f32, in vregs

    # Flatten + Linear(FEAT -> HIDDEN): one (RT,256)@(256,HP*128) matmul, then
    # sum the HP diagonal (TB,128) blocks (row block hp <-> lane block hp).
    y = jnp.dot(pool.astype(jnp.bfloat16), w1_ref[...],
                preferred_element_type=jnp.float32)              # (RT, H1)
    h = y[0:TB, 0:HIDDEN]
    for hp in range(1, HP):
        h = h + y[hp * TB:(hp + 1) * TB, hp * HIDDEN:(hp + 1) * HIDDEN]
    h = jnp.maximum(h + b1_ref[...], 0.0)                        # (TB, HIDDEN) f32

    # Linear(HIDDEN -> num_classes), zero-padded to 128 lanes for a dense store.
    out_ref[...] = (jnp.dot(h.astype(jnp.bfloat16), w2_ref[...],
                            preferred_element_type=jnp.float32) + b2_ref[...])


def prepare_params(params):
    """One-time parameter repacking + im2col index table (off the forward path)."""
    w_conv, b_conv, w1, b1, w2, b2 = params

    # Conv weight (COUT, CIN, 3, 3) -> row-Toeplitz so one matmul covers all
    # 3x3 taps AND both dw phases: rows = (kh, padded_w, cin) zero-padded to KP,
    # cols = (dw, wp, cout).  Stored bf16 for the MXU.
    wt = np.asarray(w_conv, np.float32).transpose(2, 3, 1, 0)        # (kh, kw, ci, co)
    toe = np.zeros((3, W + 2, CIN, W, COUT), np.float32)
    for kw in range(3):
        for w in range(W):
            toe[:, w + kw, :, w, :] = wt[:, kw, :, :]
    toe = toe.reshape(3, W + 2, CIN, WP, 2, COUT)                    # (kh,pw,ci,wp,dw,co)
    toe = toe.transpose(0, 1, 2, 4, 3, 5).reshape(KROWS, WLANES)     # (kh,pw,ci | dw,wp,co)
    wconv = np.zeros((KP, WLANES), np.float32)
    wconv[:KROWS, :] = toe
    wconv = jnp.asarray(wconv, jnp.bfloat16)

    bconv = jnp.asarray(np.tile(np.asarray(b_conv, np.float32), WP).reshape(1, PCOLS))

    # w1 (HIDDEN, FEAT) with PyTorch NCHW-flatten feature order (c, hp, wp);
    # repack to (PCOLS, HP*HIDDEN) so row = (wp, c) and lane block hp holds the
    # weights for pooled row block hp.  bf16 operand, f32 accumulation.
    w1r = np.asarray(w1, np.float32).reshape(HIDDEN, COUT, HP, WP)
    w1big = jnp.asarray(w1r.transpose(3, 1, 2, 0).reshape(PCOLS, H1), jnp.bfloat16)
    b1r = jnp.asarray(np.asarray(b1, np.float32).reshape(1, HIDDEN))

    # w2 (NUM_CLASSES, HIDDEN) -> (HIDDEN, 128) zero-padded, lane-dense logits.
    w2p = np.zeros((HIDDEN, LOGITS_PAD), np.float32)
    w2p[:, :NUM_CLASSES] = np.asarray(w2, np.float32).T
    w2p = jnp.asarray(w2p, jnp.bfloat16)
    b2p = np.zeros((1, LOGITS_PAD), np.float32)
    b2p[0, :NUM_CLASSES] = np.asarray(b2, np.float32)
    b2p = jnp.asarray(b2p)

    # im2col gather table: xcols[row, k] = x_flat[idx[row, k]] where x_flat is
    # the flattened NCHW input with one zero appended (sentinel for padding
    # taps and for the KROWS->KP zero pad).  Built once with numpy.
    sentinel = B * CIN * H * W
    idx = np.full((NB, 2, HP, TB, KP), sentinel, np.int32)
    for i in range(NB):
        for dh in range(2):
            for hp in range(HP):
                for bl in range(TB):
                    b = i * TB + bl
                    for kh in range(3):
                        hs = 2 * hp + dh + kh - 1
                        if not (0 <= hs < H):
                            continue
                        for pw in range(W + 2):
                            ws = pw - 1
                            if not (0 <= ws < W):
                                continue
                            for ci in range(CIN):
                                k = (kh * (W + 2) + pw) * CIN + ci
                                idx[i, dh, hp, bl, k] = ((b * CIN + ci) * H + hs) * W + ws
    idx = jnp.asarray(idx.reshape(NB * ROWS, KP))

    return wconv, bconv, w1big, b1r, w2p, b2p, idx


def cnn_forward(x_nchw, prepared):
    wconv, bconv, w1big, b1r, w2p, b2p, idx = prepared

    # im2col via a single precomputed gather (no pad/stack/6-D-transpose chain).
    x_flat = jnp.concatenate(
        [x_nchw.astype(jnp.float32).reshape(-1), jnp.zeros((1,), jnp.float32)])
    xcols = jnp.take(x_flat, idx, axis=0).astype(jnp.bfloat16)       # (NB*ROWS, KP)

    logits_pad = pl.pallas_call(
        cnn_fused_kernel,
        out_shape=jax.ShapeDtypeStruct((B, LOGITS_PAD), jnp.float32),
        grid=(NB,),
        in_specs=[
            pl.BlockSpec((ROWS, KP), lambda i: (i, 0)),              # per-tile input
            pl.BlockSpec((KP, WLANES), lambda i: (0, 0)),            # weights: constant
            pl.BlockSpec((1, PCOLS), lambda i: (0, 0)),              #  index_maps so they
            pl.BlockSpec((PCOLS, H1), lambda i: (0, 0)),             #  stay VMEM-resident
            pl.BlockSpec((1, HIDDEN), lambda i: (0, 0)),             #  across grid steps
            pl.BlockSpec((HIDDEN, LOGITS_PAD), lambda i: (0, 0)),
            pl.BlockSpec((1, LOGITS_PAD), lambda i: (0, 0)),
        ],
        out_specs=pl.BlockSpec((TB, LOGITS_PAD), lambda i: (i, 0)),
        compiler_params=pltpu.CompilerParams(
            dimension_semantics=("parallel",)),                      # both TCs on v7x
    )(xcols, wconv, bconv, w1big, b1r, w2p, b2p)

    return logits_pad[:, :NUM_CLASSES]


if __name__ == "__main__":
    key = jax.random.PRNGKey(0)
    kx, kw0, kb0, kw1, kb1, kw2, kb2 = jax.random.split(key, 7)
    x = jax.random.normal(kx, (B, CIN, H, W), jnp.float32)

    # Deterministic synthetic parameters (shapes match the PyTorch module).
    w_conv = jax.random.normal(kw0, (COUT, CIN, 3, 3), jnp.float32) * 0.1
    b_conv = jax.random.normal(kb0, (COUT,), jnp.float32) * 0.1
    w1 = jax.random.normal(kw1, (HIDDEN, FEAT), jnp.float32) * 0.02
    b1 = jax.random.normal(kb1, (HIDDEN,), jnp.float32) * 0.02
    w2 = jax.random.normal(kw2, (NUM_CLASSES, HIDDEN), jnp.float32) * 0.05
    b2 = jax.random.normal(kb2, (NUM_CLASSES,), jnp.float32) * 0.05

    prepared = prepare_params((w_conv, b_conv, w1, b1, w2, b2))      # one-time prep
    forward = jax.jit(cnn_forward)

    out = jax.block_until_ready(forward(x, prepared))
    assert out.shape == (B, NUM_CLASSES) and out.dtype == jnp.float32
    assert bool(jnp.all(jnp.isfinite(out)))
    print("KERNEL_OK")
</pallas_src>

<mosaic_0001>
module attributes {stable_mosaic.version = 11 : i64} {
  func.func @cnn_fused_kernel(%arg0: i32, %arg1: memref<32x256xbf16, #tpu.memory_space<vmem>>, %arg2: memref<256x512xbf16, #tpu.memory_space<vmem>>, %arg3: memref<1x256xf32, #tpu.memory_space<vmem>>, %arg4: memref<256x1024xbf16, #tpu.memory_space<vmem>>, %arg5: memref<1x128xf32, #tpu.memory_space<vmem>>, %arg6: memref<128x128xbf16, #tpu.memory_space<vmem>>, %arg7: memref<1x128xf32, #tpu.memory_space<vmem>>, %arg8: memref<2x128xf32, #tpu.memory_space<vmem>>) attributes {dimension_semantics = [#tpu.dimension_semantics<parallel>], iteration_bounds = array<i64: 1>, scalar_prefetch = 0 : i64, scratch_operands = 0 : i64, tpu.core_type = #tpu.core_type<tc>, window_params = [{transform_indices = @transform_0, window_bounds = array<i64: 32, 256>}, {pipeline_mode = #tpu.pipeline_mode<synchronous>, transform_indices = @transform_1, window_bounds = array<i64: 256, 512>}, {pipeline_mode = #tpu.pipeline_mode<synchronous>, transform_indices = @transform_2, window_bounds = array<i64: 1, 256>}, {pipeline_mode = #tpu.pipeline_mode<synchronous>, transform_indices = @transform_3, window_bounds = array<i64: 256, 1024>}, {pipeline_mode = #tpu.pipeline_mode<synchronous>, transform_indices = @transform_4, window_bounds = array<i64: 1, 128>}, {pipeline_mode = #tpu.pipeline_mode<synchronous>, transform_indices = @transform_5, window_bounds = array<i64: 128, 128>}, {pipeline_mode = #tpu.pipeline_mode<synchronous>, transform_indices = @transform_6, window_bounds = array<i64: 1, 128>}, {transform_indices = @transform_7, window_bounds = array<i64: 2, 128>}]} {
    %c0 = arith.constant 0 : index
    %c0_0 = arith.constant 0 : index
    %0 = vector.load %arg1[%c0, %c0_0] : memref<32x256xbf16, #tpu.memory_space<vmem>>, vector<32x256xbf16>
    %c0_1 = arith.constant 0 : index
    %c0_2 = arith.constant 0 : index
    %1 = vector.load %arg2[%c0_1, %c0_2] : memref<256x512xbf16, #tpu.memory_space<vmem>>, vector<256x512xbf16>
    %cst = arith.constant dense<0.000000e+00> : vector<32x512xf32>
    %2 = tpu.matmul %0, %1, %cst {dimension_numbers = #tpu.dot_dimension_numbers<[1], [0], [0], [1], [0, 0, 1, 1], [], []>} : vector<32x256xbf16>, vector<256x512xbf16>, vector<32x512xf32> -> vector<32x512xf32>
    %3 = vector.extract_strided_slice %2 {offsets = [0, 0], sizes = [16, 256], strides = [1, 1]} : vector<32x512xf32> to vector<16x256xf32>
    %4 = vector.extract_strided_slice %2 {offsets = [0, 256], sizes = [16, 256], strides = [1, 1]} : vector<32x512xf32> to vector<16x256xf32>
    %5 = vector.extract_strided_slice %2 {offsets = [16, 0], sizes = [16, 256], strides = [1, 1]} : vector<32x512xf32> to vector<16x256xf32>
    %6 = vector.extract_strided_slice %2 {offsets = [16, 256], sizes = [16, 256], strides = [1, 1]} : vector<32x512xf32> to vector<16x256xf32>
    %7 = arith.maximumf %3, %4 : vector<16x256xf32>
    %8 = arith.maximumf %5, %6 : vector<16x256xf32>
    %9 = arith.maximumf %7, %8 : vector<16x256xf32>
    %c0_3 = arith.constant 0 : index
    %c0_4 = arith.constant 0 : index
    %10 = vector.load %arg3[%c0_3, %c0_4] : memref<1x256xf32, #tpu.memory_space<vmem>>, vector<1x256xf32>
    %11 = vector.broadcast %10 : vector<1x256xf32> to vector<16x256xf32>
    %12 = arith.addf %9, %11 : vector<16x256xf32>
    %cst_5 = arith.constant 0.000000e+00 : f32
    %13 = vector.broadcast %cst_5 : f32 to vector<16x256xf32>
    %14 = arith.maximumf %12, %13 : vector<16x256xf32>
    %15 = arith.truncf %14 : vector<16x256xf32> to vector<16x256xbf16>
    %c0_6 = arith.constant 0 : index
    %c0_7 = arith.constant 0 : index
    %16 = vector.load %arg4[%c0_6, %c0_7] : memref<256x1024xbf16, #tpu.memory_space<vmem>>, vector<256x1024xbf16>
    %cst_8 = arith.constant dense<0.000000e+00> : vector<16x1024xf32>
    %17 = tpu.matmul %15, %16, %cst_8 {dimension_numbers = #tpu.dot_dimension_numbers<[1], [0], [0], [1], [0, 0, 1, 1], [], []>} : vector<16x256xbf16>, vector<256x1024xbf16>, vector<16x1024xf32> -> vector<16x1024xf32>
    %18 = vector.extract_strided_slice %17 {offsets = [0, 0], sizes = [2, 128], strides = [1, 1]} : vector<16x1024xf32> to vector<2x128xf32>
    %19 = vector.extract_strided_slice %17 {offsets = [2, 128], sizes = [2, 128], strides = [1, 1]} : vector<16x1024xf32> to vector<2x128xf32>
    %20 = arith.addf %18, %19 : vector<2x128xf32>
    %21 = vector.extract_strided_slice %17 {offsets = [4, 256], sizes = [2, 128], strides = [1, 1]} : vector<16x1024xf32> to vector<2x128xf32>
    %22 = arith.addf %20, %21 : vector<2x128xf32>
    %23 = vector.extract_strided_slice %17 {offsets = [6, 384], sizes = [2, 128], strides = [1, 1]} : vector<16x1024xf32> to vector<2x128xf32>
    %24 = arith.addf %22, %23 : vector<2x128xf32>
    %25 = vector.extract_strided_slice %17 {offsets = [8, 512], sizes = [2, 128], strides = [1, 1]} : vector<16x1024xf32> to vector<2x128xf32>
    %26 = arith.addf %24, %25 : vector<2x128xf32>
    %27 = vector.extract_strided_slice %17 {offsets = [10, 640], sizes = [2, 128], strides = [1, 1]} : vector<16x1024xf32> to vector<2x128xf32>
    %28 = arith.addf %26, %27 : vector<2x128xf32>
    %29 = vector.extract_strided_slice %17 {offsets = [12, 768], sizes = [2, 128], strides = [1, 1]} : vector<16x1024xf32> to vector<2x128xf32>
    %30 = arith.addf %28, %29 : vector<2x128xf32>
    %31 = vector.extract_strided_slice %17 {offsets = [14, 896], sizes = [2, 128], strides = [1, 1]} : vector<16x1024xf32> to vector<2x128xf32>
    %32 = arith.addf %30, %31 : vector<2x128xf32>
    %c0_9 = arith.constant 0 : index
    %c0_10 = arith.constant 0 : index
    %33 = vector.load %arg5[%c0_9, %c0_10] : memref<1x128xf32, #tpu.memory_space<vmem>>, vector<1x128xf32>
    %34 = vector.broadcast %33 : vector<1x128xf32> to vector<2x128xf32>
    %35 = arith.addf %32, %34 : vector<2x128xf32>
    %cst_11 = arith.constant 0.000000e+00 : f32
    %36 = vector.broadcast %cst_11 : f32 to vector<2x128xf32>
    %37 = arith.maximumf %35, %36 : vector<2x128xf32>
    %38 = arith.truncf %37 : vector<2x128xf32> to vector<2x128xbf16>
    %c0_12 = arith.constant 0 : index
    %c0_13 = arith.constant 0 : index
    %39 = vector.load %arg6[%c0_12, %c0_13] : memref<128x128xbf16, #tpu.memory_space<vmem>>, vector<128x128xbf16>
    %cst_14 = arith.constant dense<0.000000e+00> : vector<2x128xf32>
    %40 = tpu.matmul %38, %39, %cst_14 {dimension_numbers = #tpu.dot_dimension_numbers<[1], [0], [0], [1], [0, 0, 1, 1], [], []>} : vector<2x128xbf16>, vector<128x128xbf16>, vector<2x128xf32> -> vector<2x128xf32>
    %c0_15 = arith.constant 0 : index
    %c0_16 = arith.constant 0 : index
    %41 = vector.load %arg7[%c0_15, %c0_16] : memref<1x128xf32, #tpu.memory_space<vmem>>, vector<1x128xf32>
    %42 = vector.broadcast %41 : vector<1x128xf32> to vector<2x128xf32>
    %43 = arith.addf %40, %42 : vector<2x128xf32>
    %c0_17 = arith.constant 0 : index
    %c0_18 = arith.constant 0 : index
    %44 = vector.load %arg8[%c0_17, %c0_18] : memref<2x128xf32, #tpu.memory_space<vmem>>, vector<2x128xf32>
    tpu.vector_store %arg8[%c0_17, %c0_18], %43 {strides = array<i32>} : memref<2x128xf32, #tpu.memory_space<vmem>>, vector<2x128xf32>,
    return
  }
  func.func @transform_0(%arg0: i32) -> (i32, i32) {
    %c0_i32 = arith.constant 0 : i32
    %c0_i32_0 = arith.constant 0 : i32
    return %arg0, %c0_i32 : i32, i32
  }
  func.func @transform_1(%arg0: i32) -> (i32, i32) {
    %c0_i32 = arith.constant 0 : i32
    %c0_i32_0 = arith.constant 0 : i32
    %c0_i32_1 = arith.constant 0 : i32
    return %c0_i32, %c0_i32_0 : i32, i32
  }
  func.func @transform_2(%arg0: i32) -> (i32, i32) {
    %c0_i32 = arith.constant 0 : i32
    %c0_i32_0 = arith.constant 0 : i32
    %c0_i32_1 = arith.constant 0 : i32
    return %c0_i32, %c0_i32_0 : i32, i32
  }
  func.func @transform_3(%arg0: i32) -> (i32, i32) {
    %c0_i32 = arith.constant 0 : i32
    %c0_i32_0 = arith.constant 0 : i32
    %c0_i32_1 = arith.constant 0 : i32
    return %c0_i32, %c0_i32_0 : i32, i32
  }
  func.func @transform_4(%arg0: i32) -> (i32, i32) {
    %c0_i32 = arith.constant 0 : i32
    %c0_i32_0 = arith.constant 0 : i32
    %c0_i32_1 = arith.constant 0 : i32
    return %c0_i32, %c0_i32_0 : i32, i32
  }
  func.func @transform_5(%arg0: i32) -> (i32, i32) {
    %c0_i32 = arith.constant 0 : i32
    %c0_i32_0 = arith.constant 0 : i32
    %c0_i32_1 = arith.constant 0 : i32
    return %c0_i32, %c0_i32_0 : i32, i32
  }
  func.func @transform_6(%arg0: i32) -> (i32, i32) {
    %c0_i32 = arith.constant 0 : i32
    %c0_i32_0 = arith.constant 0 : i32
    %c0_i32_1 = arith.constant 0 : i32
    return %c0_i32, %c0_i32_0 : i32, i32
  }
  func.func @transform_7(%arg0: i32) -> (i32, i32) {
    %c0_i32 = arith.constant 0 : i32
    %c0_i32_0 = arith.constant 0 : i32
    return %arg0, %c0_i32 : i32, i32
  }
}

</mosaic_0001>

<bundles_post_ra>
// kernel: cnn_forward.1
= control target key start
LH: loop header
LB: loop body
LE: loop exit
PB: predicated region body
PF: predicated region fallthrough
CT: control target
= control target key end

     0   :  { %s2745_s0 = inlined_call_operand.vmem [shape: bf16[32,256], index: 0, kind: input, shape index: {}]   ;;  %s2746_s1 = inlined_call_operand.vmem [shape: bf16[256,512], index: 1, kind: input, shape index: {}]   ;;  %s2747_s2 = inlined_call_operand.vmem [shape: f32[1,256], index: 2, kind: input, shape index: {}]   ;;  %s2748_s3 = inlined_call_operand.vmem [shape: bf16[256,1024], index: 3, kind: input, shape index: {}]   ;;  %s2749_s4 = inlined_call_operand.vmem [shape: f32[1,128], index: 4, kind: input, shape index: {}]   ;;  %s2750_s5 = inlined_call_operand.vmem [shape: bf16[128,128], index: 5, kind: input, shape index: {}]   ;;  %s2751_s6 = inlined_call_operand.vmem [shape: f32[1,128], index: 6, kind: input, shape index: {}]   ;;  %s2752_s7 = inlined_call_operand.hbm [shape: f32[2,128], index: 7, kind: output, shape index: {}]  }
   0x1   :  { %v1907_v0 = vld [vmem:[%s2746_s1 + $0x4] ss:$16 sps:$4 sm:$0xff]   ;;  %v1909_v1 = vld [vmem:[%s2746_s1 + $0xc] ss:$16 sps:$4 sm:$0xff]   ;;  %v1911_v2 = vld [vmem:[%s2746_s1] ss:$16 sps:$4 sm:$0xff]  }
   0x2   :  { %436 = vmatprep.subr.bf16.mxu0 %v1907_v0  ;;  %v1912_v3 = vld [vmem:[%s2746_s1 + $0x8] ss:$16 sps:$4 sm:$0xff]   ;;  %489 = vmatprep.subr.bf16.mxu1 %v1909_v1  ;;  %v1913_v4 = vld [vmem:[%s2746_s1 + $0x24] ss:$16 sps:$4 sm:$0xff]   ;;  %v1915_v5 = vld [vmem:[%s2746_s1 + $0x2c] ss:$16 sps:$4 sm:$0xff]  }
   0x3   :  { %437 = vmatpush1.bf16.msra.mxu0 %v1911_v2  ;;  %490 = vmatpush1.bf16.msra.mxu1 %v1912_v3  ;;  %v1917_v6 = vld [vmem:[%s2746_s1 + $0x20] ss:$16 sps:$4 sm:$0xff]   ;;  %v1918_v7 = vld [vmem:[%s2746_s1 + $0x28] ss:$16 sps:$4 sm:$0xff]   ;;  %v1919_v8 = vld [vmem:[%s2746_s1 + $0x44] ss:$16 sps:$4 sm:$0xff]  }
   0x4   :  { %438 = vmatprep.subr.bf16.mxu0 %v1913_v4  ;;  %491 = vmatprep.subr.bf16.mxu1 %v1915_v5  ;;  %v1921_v9 = vld [vmem:[%s2746_s1 + $0x4c] ss:$16 sps:$4 sm:$0xff]   ;;  %v1923_v10 = vld [vmem:[%s2746_s1 + $0x40] ss:$16 sps:$4 sm:$0xff]   ;;  %v1924_v11 = vld [vmem:[%s2746_s1 + $0x48] ss:$16 sps:$4 sm:$0xff]  }
   0x5   :  { %v1925_v12 = vld [vmem:[%s2746_s1 + $0x64] ss:$16 sps:$4 sm:$0xff]   ;;  %v1927_v13 = vld [vmem:[%s2746_s1 + $0x6c] ss:$16 sps:$4 sm:$0xff]   ;;  %v1929_v14 = vld [vmem:[%s2746_s1 + $0x60] ss:$16 sps:$4 sm:$0xff]  }
   0x6   :  { %v1930_v15 = vld [vmem:[%s2746_s1 + $0x68] ss:$16 sps:$4 sm:$0xff]   ;;  %v1931_v16 = vld [vmem:[%s2746_s1 + $0x84] ss:$16 sps:$4 sm:$0xff]   ;;  %v1933_v17 = vld [vmem:[%s2746_s1 + $0x8c] ss:$16 sps:$4 sm:$0xff]  }
   0x7   :  { %439 = vmatpush1.bf16.msra.mxu0 %v1917_v6  ;;  %492 = vmatpush1.bf16.msra.mxu1 %v1918_v7  ;;  %v1935_v18 = vld [vmem:[%s2746_s1 + $0x80] ss:$16 sps:$4 sm:$0xff]   ;;  %v1936_v19 = vld [vmem:[%s2746_s1 + $0x88] ss:$16 sps:$4 sm:$0xff]   ;;  %v1937_v20 = vld [vmem:[%s2746_s1 + $0xa4] ss:$16 sps:$4 sm:$0xff]  }
   0x8   :  { %440 = vmatprep.subr.bf16.mxu0 %v1919_v8  ;;  %493 = vmatprep.subr.bf16.mxu1 %v1921_v9  ;;  %v1939_v21 = vld [vmem:[%s2746_s1 + $0xac] ss:$16 sps:$4 sm:$0xff]   ;;  %v1941_v22 = vld [vmem:[%s2746_s1 + $0xa0] ss:$16 sps:$4 sm:$0xff]   ;;  %v1942_v23 = vld [vmem:[%s2746_s1 + $0xa8] ss:$16 sps:$4 sm:$0xff]  }
   0x9   :  { %v1943_v24 = vld [vmem:[%s2746_s1 + $0xc4] ss:$16 sps:$4 sm:$0xff]   ;;  %v1945_v25 = vld [vmem:[%s2746_s1 + $0xcc] ss:$16 sps:$4 sm:$0xff]   ;;  %v1947_v26 = vld [vmem:[%s2746_s1 + $0xc0] ss:$16 sps:$4 sm:$0xff]  }
   0xa   :  { %v1948_v27 = vld [vmem:[%s2746_s1 + $0xc8] ss:$16 sps:$4 sm:$0xff]   ;;  %v1949_v28 = vld [vmem:[%s2746_s1 + $0xe4] ss:$16 sps:$4 sm:$0xff]   ;;  %v1951_v29 = vld [vmem:[%s2746_s1 + $0xec] ss:$16 sps:$4 sm:$0xff]  }
   0xb   :  { %441 = vmatpush1.bf16.msra.mxu0 %v1923_v10  ;;  %494 = vmatpush1.bf16.msra.mxu1 %v1924_v11  ;;  %v1953_v30 = vld [vmem:[%s2746_s1 + $0xe0] ss:$16 sps:$4 sm:$0xff]   ;;  %v1954_v31 = vld [vmem:[%s2746_s1 + $0xe8] ss:$16 sps:$4 sm:$0xff]   ;;  %v1955_v32 = vld [vmem:[%s2746_s1 + $0x104] ss:$16 sps:$4 sm:$0xff]  }
   0xc   :  { %442 = vmatprep.subr.bf16.mxu0 %v1925_v12  ;;  %495 = vmatprep.subr.bf16.mxu1 %v1927_v13  ;;  %v1957_v33 = vld [vmem:[%s2746_s1 + $0x10c] ss:$16 sps:$4 sm:$0xff]   ;;  %v1959_v34 = vld [vmem:[%s2746_s1 + $0x100] ss:$16 sps:$4 sm:$0xff]   ;;  %v1960_v35 = vld [vmem:[%s2746_s1 + $0x108] ss:$16 sps:$4 sm:$0xff]  }
   0xd   :  { %v1961_v36 = vld [vmem:[%s2746_s1 + $0x124] ss:$16 sps:$4 sm:$0xff]   ;;  %v1963_v37 = vld [vmem:[%s2746_s1 + $0x12c] ss:$16 sps:$4 sm:$0xff]   ;;  %v1965_v38 = vld [vmem:[%s2746_s1 + $0x120] ss:$16 sps:$4 sm:$0xff]  }
   0xe   :  { %v1966_v39 = vld [vmem:[%s2746_s1 + $0x128] ss:$16 sps:$4 sm:$0xff]   ;;  %v1967_v40 = vld [vmem:[%s2746_s1 + $0x144] ss:$16 sps:$4 sm:$0xff]   ;;  %v1969_v41 = vld [vmem:[%s2746_s1 + $0x14c] ss:$16 sps:$4 sm:$0xff]  }
   0xf   :  { %443 = vmatpush1.bf16.msra.mxu0 %v1929_v14  ;;  %496 = vmatpush1.bf16.msra.mxu1 %v1930_v15  ;;  %v1971_v42 = vld [vmem:[%s2746_s1 + $0x140] ss:$16 sps:$4 sm:$0xff]   ;;  %v1972_v43 = vld [vmem:[%s2746_s1 + $0x148] ss:$16 sps:$4 sm:$0xff]   ;;  %v1973_v44 = vld [vmem:[%s2746_s1 + $0x164] ss:$16 sps:$4 sm:$0xff]  }
  0x10   :  { %444 = vmatprep.subr.bf16.mxu0 %v1931_v16  ;;  %497 = vmatprep.subr.bf16.mxu1 %v1933_v17  ;;  %v1975_v45 = vld [vmem:[%s2746_s1 + $0x16c] ss:$16 sps:$4 sm:$0xff]   ;;  %v1977_v46 = vld [vmem:[%s2746_s1 + $0x160] ss:$16 sps:$4 sm:$0xff]   ;;  %v1978_v48 = vld [vmem:[%s2746_s1 + $0x168] ss:$16 sps:$4 sm:$0xff]  }
  0x11   :  { %v2005_v47 = vld [vmem:[%s2745_s0 + $0x4] ss:$8 sps:$4 sm:$0xff]   ;;  %v1983_v51 = vld [vmem:[%s2746_s1 + $0x180] ss:$16 sps:$4 sm:$0xff]   ;;  %v1984_v52 = vld [vmem:[%s2746_s1 + $0x188] ss:$16 sps:$4 sm:$0xff]  }
  0x12   :  { %v1979_v49 = vld [vmem:[%s2746_s1 + $0x184] ss:$16 sps:$4 sm:$0xff]   ;;  %v1981_v50 = vld [vmem:[%s2746_s1 + $0x18c] ss:$16 sps:$4 sm:$0xff]   ;;  %468 = vmatprep.mubr.bf16.mxu0 %v2005_v47  ;;  %521 = vmatprep.mubr.bf16.mxu1 %v2005_v47  ;;  %v1989_v55 = vld [vmem:[%s2746_s1 + $0x1a0] ss:$16 sps:$4 sm:$0xff]  }
  0x13   :  { %445 = vmatpush1.bf16.msra.mxu0 %v1935_v18  ;;  %498 = vmatpush1.bf16.msra.mxu1 %v1936_v19  ;;  %v1985_v53 = vld [vmem:[%s2746_s1 + $0x1a4] ss:$16 sps:$4 sm:$0xff]   ;;  %v1987_v54 = vld [vmem:[%s2746_s1 + $0x1ac] ss:$16 sps:$4 sm:$0xff]   ;;  %v1990_v56 = vld [vmem:[%s2746_s1 + $0x1a8] ss:$16 sps:$4 sm:$0xff]  }
  0x14   :  { %446 = vmatprep.subr.bf16.mxu0 %v1937_v20  ;;  %499 = vmatprep.subr.bf16.mxu1 %v1939_v21  ;;  %v1991_v57 = vld [vmem:[%s2746_s1 + $0x1c4] ss:$16 sps:$4 sm:$0xff]   ;;  %v1993_v58 = vld [vmem:[%s2746_s1 + $0x1cc] ss:$16 sps:$4 sm:$0xff]   ;;  %v1995_v59 = vld [vmem:[%s2746_s1 + $0x1c0] ss:$16 sps:$4 sm:$0xff]  }
  0x15   :  { %v1996_v60 = vld [vmem:[%s2746_s1 + $0x1c8] ss:$16 sps:$4 sm:$0xff]   ;;  %v1997_v61 = vld [vmem:[%s2746_s1 + $0x1e4] ss:$16 sps:$4 sm:$0xff]   ;;  %v1999_v62 = vld [vmem:[%s2746_s1 + $0x1ec] ss:$16 sps:$4 sm:$0xff]  }
  0x16   :  { %v576_v63 = vld [vmem:[%s2748_s3] sm:$0xff]  ;;  %v577_v1 = vld [vmem:[%s2748_s3 + $0x8] sm:$0xff]  ;;  %v2006_v12 = vld [vmem:[%s2745_s0 + $0x14] ss:$8 sps:$4 sm:$0xff]  }
  0x17   :  { %447 = vmatpush1.bf16.msra.mxu0 %v1941_v22  ;;  %500 = vmatpush1.bf16.msra.mxu1 %v1942_v23  ;;  %v580_v0 = vld [vmem:[%s2748_s3 + $0x20] sm:$0xff]  ;;  %v581_v2 = vld [vmem:[%s2748_s3 + $0x28] sm:$0xff] }
  0x18   :  { %448 = vmatprep.subr.bf16.mxu0 %v1943_v24  ;;  %501 = vmatprep.subr.bf16.mxu1 %v1945_v25  ;;  %v2001_v3 = vld [vmem:[%s2746_s1 + $0x1e0] ss:$16 sps:$4 sm:$0xff]   ;;  %v2002_v4 = vld [vmem:[%s2746_s1 + $0x1e8] ss:$16 sps:$4 sm:$0xff]   ;;  %v1738_v6 = vcombine.high %v576_v63, %v580_v0  ;;  %v1740_v7 = vcombine.high %v577_v1, %v581_v2  ;;  %v1737_v13 = vcombine.low %v576_v63, %v580_v0 }
  0x19   :  { %v2003_v5 = vld [vmem:[%s2745_s0] ss:$8 sps:$4 sm:$0xff]   ;;  %v1739_v14 = vcombine.low %v577_v1, %v581_v2 }
  0x1a   :  { %v584_v8 = vld [vmem:[%s2748_s3 + $0x40] sm:$0xff]  ;;  %v585_v10 = vld [vmem:[%s2748_s3 + $0x48] sm:$0xff] }
  0x1b   :  { %449 = vmatpush1.bf16.msra.mxu0 %v1947_v26  ;;  %502 = vmatpush1.bf16.msra.mxu1 %v1948_v27  ;;  %v588_v9 = vld [vmem:[%s2748_s3 + $0x60] sm:$0xff]  ;;  %v589_v11 = vld [vmem:[%s2748_s3 + $0x68] sm:$0xff] }
  0x1c   :  { %450 = vmatprep.subr.bf16.mxu0 %v1949_v28  ;;  %503 = vmatprep.subr.bf16.mxu1 %v1951_v29 }
  0x1f   :  { %451 = vmatpush1.bf16.msra.mxu0 %v1953_v30  ;;  %504 = vmatpush1.bf16.msra.mxu1 %v1954_v31 }
  0x20   :  { %452 = vmatprep.subr.bf16.mxu0 %v1955_v32  ;;  %505 = vmatprep.subr.bf16.mxu1 %v1957_v33 }
  0x23   :  { %453 = vmatpush1.bf16.msra.mxu0 %v1959_v34  ;;  %506 = vmatpush1.bf16.msra.mxu1 %v1960_v35 }
  0x24   :  { %454 = vmatprep.subr.bf16.mxu0 %v1961_v36  ;;  %507 = vmatprep.subr.bf16.mxu1 %v1963_v37 }
  0x27   :  { %455 = vmatpush1.bf16.msra.mxu0 %v1965_v38  ;;  %508 = vmatpush1.bf16.msra.mxu1 %v1966_v39 }
  0x28   :  { %456 = vmatprep.subr.bf16.mxu0 %v1967_v40  ;;  %509 = vmatprep.subr.bf16.mxu1 %v1969_v41 }
  0x2b   :  { %457 = vmatpush1.bf16.msra.mxu0 %v1971_v42  ;;  %510 = vmatpush1.bf16.msra.mxu1 %v1972_v43 }
  0x2c   :  { %458 = vmatprep.subr.bf16.mxu0 %v1973_v44  ;;  %511 = vmatprep.subr.bf16.mxu1 %v1975_v45 }
  0x2f   :  { %459 = vmatpush1.bf16.msra.mxu0 %v1977_v46  ;;  %512 = vmatpush1.bf16.msra.mxu1 %v1978_v48 }
  0x30   :  { %460 = vmatprep.subr.bf16.mxu0 %v1979_v49  ;;  %513 = vmatprep.subr.bf16.mxu1 %v1981_v50 }
  0x33   :  { %461 = vmatpush1.bf16.msra.mxu0 %v1983_v51  ;;  %514 = vmatpush1.bf16.msra.mxu1 %v1984_v52 }
  0x34   :  { %462 = vmatprep.subr.bf16.mxu0 %v1985_v53  ;;  %515 = vmatprep.subr.bf16.mxu1 %v1987_v54 }
  0x37   :  { %463 = vmatpush1.bf16.msra.mxu0 %v1989_v55  ;;  %516 = vmatpush1.bf16.msra.mxu1 %v1990_v56 }
  0x38   :  { %464 = vmatprep.subr.bf16.mxu0 %v1991_v57  ;;  %517 = vmatprep.subr.bf16.mxu1 %v1993_v58 }
  0x3b   :  { %465 = vmatpush1.bf16.msra.mxu0 %v1995_v59  ;;  %518 = vmatpush1.bf16.msra.mxu1 %v1996_v60 }
  0x3c   :  { %466 = vmatprep.subr.bf16.mxu0 %v1997_v61  ;;  %519 = vmatprep.subr.bf16.mxu1 %v1999_v62 }
  0x3f   :  { %467 = vmatpush1.bf16.msra.mxu0 %v2001_v3  ;;  %520 = vmatpush1.bf16.msra.mxu1 %v2002_v4 }
  0x40   :  { %1344 = vmatprep.subr.bf16.mxu0 %v1738_v6  ;;  %1385 = vmatprep.subr.bf16.mxu1 %v1740_v7 }
  0x41   :  { %12 = vsyncpa [#allocation3], 0  ;;  %v1746_v15 = vcombine.high %v584_v8, %v588_v9  ;;  %v1748_v16 = vcombine.high %v585_v10, %v589_v11  ;;  %v592_v17 = vld [vmem:[%s2748_s3 + $0x80] sm:$0xff]  ;;  %v593_v19 = vld [vmem:[%s2748_s3 + $0x88] sm:$0xff]  ;;  %v1745_v21 = vcombine.low %v584_v8, %v588_v9  ;;  %v1747_v22 = vcombine.low %v585_v10, %v589_v11  ;;  %s2043_s18 = smov [#allocation2]  }
  0x42   :  { %469 = vmatmul.mubr.bf16.vlgmr.msra.gmra.mrb[0].mxu0 %v2003_v5  ;;  %522 = vmatmul.mubr.bf16.vlgmr.msra.gmra.mrb[0].mxu1 %v2003_v5  ;;  %v596_v18 = vld [vmem:[%s2748_s3 + $0xa0] sm:$0xff]  ;;  %v597_v20 = vld [vmem:[%s2748_s3 + $0xa8] sm:$0xff]  ;;  %v2008_v23 = vld [vmem:[%s2745_s0 + $0x10] ss:$8 sps:$4 sm:$0xff]   ;;  %vm2042_vm0 = vmmov 0   ;;  %s1661_s19 = sshll.u32 %s2043_s18, 4  ;;  %s1662_s19 = int_to_ptr.vmem [resolvable:$true] %s1661_s19 }
  0x43   :  { %478 = vmatprep.mubr.bf16.mxu0 %v2006_v12  ;;  %531 = vmatprep.mubr.bf16.mxu1 %v2006_v12  ;;  %v1754_v24 = vcombine.high %v592_v17, %v596_v18  ;;  %v1756_v25 = vcombine.high %v593_v19, %v597_v20  ;;  %v600_v26 = vld [vmem:[%s2748_s3 + $0xc0] sm:$0xff]  ;;  %v601_v28 = vld [vmem:[%s2748_s3 + $0xc8] sm:$0xff]  ;;  %v1753_v30 = vcombine.low %v592_v17, %v596_v18  ;;  %s2017_s20 = scalar_lea.vmem %s1662_s19, 32  ;;  %p2022_p1 = scmp.lt.s32.totalorder %s1662_s19, %s1662_s19 }
  0x44   :  { %1345 = vmatpush1.bf16.msra.mxu0 %v1737_v13  ;;  %1386 = vmatpush1.bf16.msra.mxu1 %v1739_v14  ;;  %v604_v27 = vld [vmem:[%s2748_s3 + $0xe0] sm:$0xff]  ;;  %v605_v29 = vld [vmem:[%s2748_s3 + $0xe8] sm:$0xff]  ;;  %v1755_v31 = vcombine.low %v593_v19, %v597_v20  ;;  %p2018_p0 = scmp.ne.s32.totalorder %s1662_s19, %s2017_s20  ;;  %p2023_p2 = scmp.lt.s32.totalorder %s2017_s20, %s2017_s20 }
  0x45   :  { %1346 = vmatprep.subr.bf16.mxu0 %v1746_v15  ;;  %1387 = vmatprep.subr.bf16.mxu1 %v1748_v16  ;;  %v1762_v32 = vcombine.high %v600_v26, %v604_v27  ;;  %v1764_v33 = vcombine.high %v601_v28, %v605_v29  ;;  %v608_v34 = vld [vmem:[%s2748_s3 + $0x100] sm:$0xff]  ;;  %v609_v36 = vld [vmem:[%s2748_s3 + $0x108] sm:$0xff]  ;;  %v1761_v38 = vcombine.low %v600_v26, %v604_v27 }
  0x46   :  { %v612_v35 = vld [vmem:[%s2748_s3 + $0x120] sm:$0xff]  ;;  %v613_v37 = vld [vmem:[%s2748_s3 + $0x128] sm:$0xff]  ;;  %v1763_v39 = vcombine.low %v601_v28, %v605_v29  ;;  %p2024_p3 = por %p2023_p2, %p2022_p1 }
  0x47   :  { %v1770_v40 = vcombine.high %v608_v34, %v612_v35  ;;  %v1772_v41 = vcombine.high %v609_v36, %v613_v37  ;;  %v616_v42 = vld [vmem:[%s2748_s3 + $0x140] sm:$0xff]  ;;  %v617_v44 = vld [vmem:[%s2748_s3 + $0x148] sm:$0xff]  ;;  %v1769_v46 = vcombine.low %v608_v34, %v612_v35  ;;  %v1771_v47 = vcombine.low %v609_v36, %v613_v37 }
  0x48   :  { %1347 = vmatpush1.bf16.msra.mxu0 %v1745_v21  ;;  %1388 = vmatpush1.bf16.msra.mxu1 %v1747_v22  ;;  %v620_v43 = vld [vmem:[%s2748_s3 + $0x160] sm:$0xff]  ;;  %v621_v45 = vld [vmem:[%s2748_s3 + $0x168] sm:$0xff]  ;;  %p2025_p4 = pnand %p2024_p3, %p2018_p0 }
  0x49   :  { %1348 = vmatprep.subr.bf16.mxu0 %v1754_v24  ;;  %1389 = vmatprep.subr.bf16.mxu1 %v1756_v25  ;;  %v1778_v48 = vcombine.high %v616_v42, %v620_v43  ;;  %v1780_v49 = vcombine.high %v617_v44, %v621_v45  ;;  %v624_v50 = vld [vmem:[%s2748_s3 + $0x180] sm:$0xff]  ;;  %v625_v52 = vld [vmem:[%s2748_s3 + $0x188] sm:$0xff]  ;;  %v1777_v54 = vcombine.low %v616_v42, %v620_v43 }
  0x4a   :  { %479 = vmatmul.mubr.bf16.gmra.mrb[4].mxu0 %v2008_v23  ;;  %532 = vmatmul.mubr.bf16.gmra.mrb[4].mxu1 %v2008_v23  ;;  %v628_v51 = vld [vmem:[%s2748_s3 + $0x1a0] sm:$0xff]  ;;  %v629_v53 = vld [vmem:[%s2748_s3 + $0x1a8] sm:$0xff]  ;;  %v1779_v55 = vcombine.low %v617_v44, %v621_v45 }
  0x4b   :  { %v1786_v56 = vcombine.high %v624_v50, %v628_v51  ;;  %v1788_v57 = vcombine.high %v625_v52, %v629_v53  ;;  %v632_v58 = vld [vmem:[%s2748_s3 + $0x1c0] sm:$0xff]  ;;  %v633_v60 = vld [vmem:[%s2748_s3 + $0x1c8] sm:$0xff]  ;;  %v1785_v62 = vcombine.low %v624_v50, %v628_v51  ;;  %v1787_v63 = vcombine.low %v625_v52, %v629_v53 }
  0x4c   :  { %1349 = vmatpush1.bf16.msra.mxu0 %v1753_v30  ;;  %1390 = vmatpush1.bf16.msra.mxu1 %v1755_v31  ;;  %v636_v59 = vld [vmem:[%s2748_s3 + $0x1e0] sm:$0xff]  ;;  %v637_v61 = vld [vmem:[%s2748_s3 + $0x1e8] sm:$0xff] }
  0x4d   :  { %1350 = vmatprep.subr.bf16.mxu0 %v1762_v32  ;;  %1391 = vmatprep.subr.bf16.mxu1 %v1764_v33  ;;  %v1794_v0 = vcombine.high %v632_v58, %v636_v59  ;;  %v1796_v1 = vcombine.high %v633_v60, %v637_v61  ;;  %v640_v2 = vld [vmem:[%s2748_s3 + $0x200] sm:$0xff]  ;;  %v641_v4 = vld [vmem:[%s2748_s3 + $0x208] sm:$0xff]  ;;  %v1793_v6 = vcombine.low %v632_v58, %v636_v59 }
  0x4e   :  { %v644_v3 = vld [vmem:[%s2748_s3 + $0x220] sm:$0xff]  ;;  %v645_v5 = vld [vmem:[%s2748_s3 + $0x228] sm:$0xff]  ;;  %v1795_v7 = vcombine.low %v633_v60, %v637_v61 }
  0x4f   :  { %v1802_v8 = vcombine.high %v640_v2, %v644_v3  ;;  %v1804_v9 = vcombine.high %v641_v4, %v645_v5  ;;  %v648_v10 = vld [vmem:[%s2748_s3 + $0x240] sm:$0xff]  ;;  %v649_v12 = vld [vmem:[%s2748_s3 + $0x248] sm:$0xff]  ;;  %v1801_v14 = vcombine.low %v640_v2, %v644_v3  ;;  %v1803_v15 = vcombine.low %v641_v4, %v645_v5  ;;  %v2483_v4 = vld [vmem:[%s2748_s3 + $0x10] sm:$0xff] }
  0x50   :  { %1351 = vmatpush1.bf16.msra.mxu0 %v1761_v38  ;;  %1392 = vmatpush1.bf16.msra.mxu1 %v1763_v39  ;;  %v652_v11 = vld [vmem:[%s2748_s3 + $0x260] sm:$0xff]  ;;  %v653_v13 = vld [vmem:[%s2748_s3 + $0x268] sm:$0xff]  ;;  %v2488_v5 = vld [vmem:[%s2748_s3 + $0x30] sm:$0xff] }
  0x51   :  { %1352 = vmatprep.subr.bf16.mxu0 %v1770_v40  ;;  %1393 = vmatprep.subr.bf16.mxu1 %v1772_v41  ;;  %v1810_v16 = vcombine.high %v648_v10, %v652_v11  ;;  %v1812_v17 = vcombine.high %v649_v12, %v653_v13  ;;  %v656_v18 = vld [vmem:[%s2748_s3 + $0x280] sm:$0xff]  ;;  %v657_v20 = vld [vmem:[%s2748_s3 + $0x288] sm:$0xff]  ;;  %v1809_v22 = vcombine.low %v648_v10, %v652_v11 }
  0x52   :  { %v660_v19 = vld [vmem:[%s2748_s3 + $0x2a0] sm:$0xff]  ;;  %v661_v21 = vld [vmem:[%s2748_s3 + $0x2a8] sm:$0xff]  ;;  %v1811_v23 = vcombine.low %v649_v12, %v653_v13  ;;  %v556_v12 = vlaneseq }
  0x53   :  { %v1818_v24 = vcombine.high %v656_v18, %v660_v19  ;;  %v1820_v25 = vcombine.high %v657_v20, %v661_v21  ;;  %v1817_v26 = vcombine.low %v656_v18, %v660_v19  ;;  %v1819_v27 = vcombine.low %v657_v20, %v661_v21  ;;  %v664_v28 = vld [vmem:[%s2748_s3 + $0x2c0] sm:$0xff]  ;;  %v665_v30 = vld [vmem:[%s2748_s3 + $0x2c8] sm:$0xff] }
  0x54   :  { %1353 = vmatpush1.bf16.msra.mxu0 %v1769_v46  ;;  %1394 = vmatpush1.bf16.msra.mxu1 %v1771_v47  ;;  %v668_v29 = vld [vmem:[%s2748_s3 + $0x2e0] sm:$0xff]  ;;  %v669_v32 = vld [vmem:[%s2748_s3 + $0x2e8] sm:$0xff]  ;;  %v557_v18 = vshrl.u32 %v556_v12, 7 }
  0x55   :  { %1354 = vmatprep.subr.bf16.mxu0 %v1778_v48  ;;  %1395 = vmatprep.subr.bf16.mxu1 %v1780_v49  ;;  %v1826_v31 = vcombine.high %v664_v28, %v668_v29  ;;  %v1825_v33 = vcombine.low %v664_v28, %v668_v29  ;;  %v1827_v34 = vcombine.low %v665_v30, %v669_v32  ;;  %v672_v36 = vld [vmem:[%s2748_s3 + $0x300] sm:$0xff]  ;;  %v673_v38 = vld [vmem:[%s2748_s3 + $0x308] sm:$0xff] }
  0x56   :  { %v1828_v35 = vcombine.high %v665_v30, %v669_v32  ;;  %v676_v37 = vld [vmem:[%s2748_s3 + $0x320] sm:$0xff]  ;;  %v677_v41 = vld [vmem:[%s2748_s3 + $0x328] sm:$0xff]  ;;  %v562_v28 = vsub.s32 1, %v557_v18 }
  0x57   :  { %v1833_v39 = vcombine.low %v672_v36, %v676_v37  ;;  %v1834_v40 = vcombine.high %v672_v36, %v676_v37  ;;  %v1835_v42 = vcombine.low %v673_v38, %v677_v41  ;;  %v1836_v43 = vcombine.high %v673_v38, %v677_v41  ;;  %v680_v44 = vld [vmem:[%s2748_s3 + $0x340] sm:$0xff]  ;;  %v681_v46 = vld [vmem:[%s2748_s3 + $0x348] sm:$0xff] }
  0x58   :  { %1355 = vmatpush1.bf16.msra.mxu0 %v1777_v54  ;;  %1396 = vmatpush1.bf16.msra.mxu1 %v1779_v55  ;;  %v684_v45 = vld [vmem:[%s2748_s3 + $0x360] sm:$0xff]  ;;  %v685_v48 = vld [vmem:[%s2748_s3 + $0x368] sm:$0xff] }
  0x59   :  { %1356 = vmatprep.subr.bf16.mxu0 %v1786_v56  ;;  %1397 = vmatprep.subr.bf16.mxu1 %v1788_v57  ;;  %v1842_v47 = vcombine.high %v680_v44, %v684_v45  ;;  %v1841_v49 = vcombine.low %v680_v44, %v684_v45  ;;  %v1843_v50 = vcombine.low %v681_v46, %v685_v48  ;;  %v688_v52 = vld [vmem:[%s2748_s3 + $0x380] sm:$0xff]  ;;  %v689_v54 = vld [vmem:[%s2748_s3 + $0x388] sm:$0xff] }
  0x5a   :  { %v1844_v51 = vcombine.high %v681_v46, %v685_v48  ;;  %v692_v53 = vld [vmem:[%s2748_s3 + $0x3a0] sm:$0xff]  ;;  %v693_v56 = vld [vmem:[%s2748_s3 + $0x3a8] sm:$0xff] }
  0x5b   :  { %v1850_v55 = vcombine.high %v688_v52, %v692_v53  ;;  %v1849_v57 = vcombine.low %v688_v52, %v692_v53  ;;  %v1851_v58 = vcombine.low %v689_v54, %v693_v56  ;;  %v1852_v59 = vcombine.high %v689_v54, %v693_v56  ;;  %v696_v60 = vld [vmem:[%s2748_s3 + $0x3c0] sm:$0xff] }
  0x5c   :  { %1357 = vmatpush1.bf16.msra.mxu0 %v1785_v62  ;;  %1398 = vmatpush1.bf16.msra.mxu1 %v1787_v63  ;;  %v700_v61 = vld [vmem:[%s2748_s3 + $0x3e0] sm:$0xff]  ;;  %v697_v62 = vld [vmem:[%s2748_s3 + $0x3c8] sm:$0xff] }
  0x5d   :  { %1358 = vmatprep.subr.bf16.mxu0 %v1794_v0  ;;  %1399 = vmatprep.subr.bf16.mxu1 %v1796_v1  ;;  %v1858_v63 = vcombine.high %v696_v60, %v700_v61  ;;  %v701_v0 = vld [vmem:[%s2748_s3 + $0x3e8] sm:$0xff]  ;;  %v1857_v1 = vcombine.low %v696_v60, %v700_v61  ;;  %v594_v61 = vld [vmem:[%s2748_s3 + $0x90] sm:$0xff] }
  0x5e   :  { %v1859_v2 = vcombine.low %v697_v62, %v701_v0  ;;  %v1860_v3 = vcombine.high %v697_v62, %v701_v0  ;;  %v598_v0 = vld [vmem:[%s2748_s3 + $0xb0] sm:$0xff] }
  0x60   :  { %1359 = vmatpush1.bf16.msra.mxu0 %v1793_v6  ;;  %1400 = vmatpush1.bf16.msra.mxu1 %v1795_v7  ;;  %v2493_v6 = vld [vmem:[%s2748_s3 + $0x18] sm:$0xff]  ;;  %v1742_v7 = vcombine.high %v2483_v4, %v2488_v5 }
  0x61   :  { %1360 = vmatprep.subr.bf16.mxu0 %v1802_v8  ;;  %1401 = vmatprep.subr.bf16.mxu1 %v1804_v9  ;;  %v2500_v8 = vld [vmem:[%s2748_s3 + $0x38] sm:$0xff]  ;;  %v1741_v9 = vcombine.low %v2483_v4, %v2488_v5  ;;  %v606_v4 = vld [vmem:[%s2748_s3 + $0xf0] sm:$0xff] }
  0x62   :  { %v1743_v10 = vcombine.low %v2493_v6, %v2500_v8  ;;  %v1744_v11 = vcombine.high %v2493_v6, %v2500_v8  ;;  %v603_v5 = vld [vmem:[%s2748_s3 + $0xd8] sm:$0xff]  ;;  %v1757_v8 = vcombine.low %v594_v61, %v598_v0 }
  0x63   :  { %v607_v6 = vld [vmem:[%s2748_s3 + $0xf8] sm:$0xff] }
  0x64   :  { %1361 = vmatpush1.bf16.msra.mxu0 %v1801_v14  ;;  %1402 = vmatpush1.bf16.msra.mxu1 %v1803_v15 }
  0x65   :  { %1362 = vmatprep.subr.bf16.mxu0 %v1810_v16  ;;  %1403 = vmatprep.subr.bf16.mxu1 %v1812_v17 }
  0x68   :  { %1363 = vmatpush1.bf16.msra.mxu0 %v1809_v22  ;;  %1404 = vmatpush1.bf16.msra.mxu1 %v1811_v23 }
  0x69   :  { %1364 = vmatprep.subr.bf16.mxu0 %v1818_v24  ;;  %1405 = vmatprep.subr.bf16.mxu1 %v1820_v25 }
  0x6c   :  { %1365 = vmatpush1.bf16.msra.mxu0 %v1817_v26  ;;  %1406 = vmatpush1.bf16.msra.mxu1 %v1819_v27  ;;  %v558_v26 = vsub.s32 0, %v557_v18  ;;  %v554_v27 = vld [vmem:[%s2747_s2] sm:$0x3]  ;;  %v615_v18 = vld [vmem:[%s2748_s3 + $0x138] sm:$0xff] }
  0x6d   :  { %1366 = vmatprep.subr.bf16.mxu0 %v1826_v31  ;;  %1407 = vmatprep.subr.bf16.mxu1 %v1828_v35  ;;  %v563_v36 = vrot.slane %v554_v27, %v562_v28 }
  0x6e   :  { %v559_v32 = vrot.slane %v554_v27, %v558_v26  ;;  %v623_v26 = vld [vmem:[%s2748_s3 + $0x178] sm:$0xff] }
  0x70   :  { %1367 = vmatpush1.bf16.msra.mxu0 %v1825_v33  ;;  %1408 = vmatpush1.bf16.msra.mxu1 %v1827_v34 }
  0x71   :  { %1368 = vmatprep.subr.bf16.mxu0 %v1834_v40  ;;  %1409 = vmatprep.subr.bf16.mxu1 %v1836_v43 }
  0x74   :  { %1369 = vmatpush1.bf16.msra.mxu0 %v1833_v39  ;;  %1410 = vmatpush1.bf16.msra.mxu1 %v1835_v42 }
  0x75   :  { %1370 = vmatprep.subr.bf16.mxu0 %v1842_v47  ;;  %1411 = vmatprep.subr.bf16.mxu1 %v1844_v51 }
  0x78   :  { %1371 = vmatpush1.bf16.msra.mxu0 %v1841_v49  ;;  %1412 = vmatpush1.bf16.msra.mxu1 %v1843_v50 }
  0x79   :  { %1372 = vmatprep.subr.bf16.mxu0 %v1850_v55  ;;  %1413 = vmatprep.subr.bf16.mxu1 %v1852_v59  ;;  %v586_v55 = vld [vmem:[%s2748_s3 + $0x50] sm:$0xff]  ;;  %v591_v59 = vld [vmem:[%s2748_s3 + $0x78] sm:$0xff] }
  0x7c   :  { %1373 = vmatpush1.bf16.msra.mxu0 %v1849_v57  ;;  %1414 = vmatpush1.bf16.msra.mxu1 %v1851_v58  ;;  %v590_v57 = vld [vmem:[%s2748_s3 + $0x70] sm:$0xff]  ;;  %v587_v58 = vld [vmem:[%s2748_s3 + $0x58] sm:$0xff] }
  0x7d   :  { %1374 = vmatprep.subr.bf16.mxu0 %v1858_v63  ;;  %1415 = vmatprep.subr.bf16.mxu1 %v1860_v3  ;;  %v1750_v62 = vcombine.high %v586_v55, %v590_v57  ;;  %v1752_v63 = vcombine.high %v587_v58, %v591_v59  ;;  %v1749_v3 = vcombine.low %v586_v55, %v590_v57  ;;  %v650_v55 = vld [vmem:[%s2748_s3 + $0x250] sm:$0xff] }
  0x7e   :  { %v654_v57 = vld [vmem:[%s2748_s3 + $0x270] sm:$0xff] }
  0x80   :  { %1375 = vmatpush1.bf16.msra.mxu0 %v1857_v1  ;;  %1416 = vmatpush1.bf16.msra.mxu1 %v1859_v2  ;;  %v595_v1 = vld [vmem:[%s2748_s3 + $0x98] sm:$0xff] }
  0x81   :  { %1426 = vmatprep.subr.bf16.mxu0 %v1742_v7  ;;  %1467 = vmatprep.subr.bf16.mxu1 %v1744_v11  ;;  %v599_v2 = vld [vmem:[%s2748_s3 + $0xb8] sm:$0xff]  ;;  %v1751_v7 = vcombine.low %v587_v58, %v591_v59  ;;  %v1758_v11 = vcombine.high %v594_v61, %v598_v0  ;;  %v658_v0 = vld [vmem:[%s2748_s3 + $0x290] sm:$0xff] }
  0x82   :  { %v1760_v12 = vcombine.high %v595_v1, %v599_v2  ;;  %v651_v58 = vld [vmem:[%s2748_s3 + $0x258] sm:$0xff] }
  0x83   :  { %v655_v59 = vld [vmem:[%s2748_s3 + $0x278] sm:$0xff] }
 0x115   :  { %v470_v13 = vpop.f32.mrb[0].mxu0  ;;  %v523_v14 = vpop.f32.mrb[0].mxu1 }
 0x116   :  { %v542_v15 = vmax.f32 %v470_v13, %v523_v14  ;;  %v472_v16 = vpop.f32.mrb[1].mxu0  ;;  %v525_v17 = vpop.f32.mrb[1].mxu1  ;;  %v602_v13 = vld [vmem:[%s2748_s3 + $0xd0] sm:$0xff]  ;;  %v1768_v14 = vcombine.high %v603_v5, %v607_v6 }
 0x117   :  { %v543_v19 = vmax.f32 %v472_v16, %v525_v17  ;;  %v474_v20 = vpop.f32.mrb[2].mxu0  ;;  %v527_v21 = vpop.f32.mrb[2].mxu1  ;;  %v614_v16 = vld [vmem:[%s2748_s3 + $0x130] sm:$0xff]  ;;  %v611_v17 = vld [vmem:[%s2748_s3 + $0x118] sm:$0xff] }
 0x118   :  { %v544_v22 = vmax.f32 %v474_v20, %v527_v21  ;;  %v476_v23 = vpop.f32.mrb[3].mxu0  ;;  %v529_v24 = vpop.f32.mrb[3].mxu1  ;;  %v1767_v20 = vcombine.low %v603_v5, %v607_v6  ;;  %v1775_v28 = vcombine.low %v611_v17, %v615_v18  ;;  %v670_v5 = vld [vmem:[%s2748_s3 + $0x2f0] sm:$0xff]  ;;  %v667_v6 = vld [vmem:[%s2748_s3 + $0x2d8] sm:$0xff] }
 0x119   :  { %v545_v25 = vmax.f32 %v476_v23, %v529_v24  ;;  %v618_v23 = vld [vmem:[%s2748_s3 + $0x150] sm:$0xff] }
 0x11a   :  { %v622_v24 = vld [vmem:[%s2748_s3 + $0x170] sm:$0xff] }
 0x11d   :  { %v480_v29 = vpop.f32.mrb[4].mxu0  ;;  %v533_v30 = vpop.f32.mrb[4].mxu1 }
 0x11e   :  { %v546_v31 = vmax.f32 %v480_v29, %v533_v30  ;;  %v482_v33 = vpop.f32.mrb[5].mxu0  ;;  %v535_v34 = vpop.f32.mrb[5].mxu1  ;;  %v1782_v29 = vcombine.high %v618_v23, %v622_v24 }
 0x11f   :  { %v547_v35 = vmax.f32 %v482_v33, %v535_v34  ;;  %v484_v37 = vpop.f32.mrb[6].mxu0  ;;  %v537_v38 = vpop.f32.mrb[6].mxu1  ;;  %v627_v33 = vld [vmem:[%s2748_s3 + $0x198] sm:$0xff] }
 0x120   :  { %v550_v39 = vmax.f32 %v542_v15, %v546_v31  ;;  %v548_v40 = vmax.f32 %v484_v37, %v537_v38  ;;  %v486_v41 = vpop.f32.mrb[7].mxu0  ;;  %v539_v42 = vpop.f32.mrb[7].mxu1  ;;  %v610_v15 = vld [vmem:[%s2748_s3 + $0x110] sm:$0xff]  ;;  %v631_v34 = vld [vmem:[%s2748_s3 + $0x1b8] sm:$0xff] }
 0x121   :  { %v551_v43 = vmax.f32 %v543_v19, %v547_v35  ;;  %v549_v44 = vmax.f32 %v486_v41, %v539_v42  ;;  %v1765_v19 = vcombine.low %v602_v13, %v606_v4  ;;  %v1774_v21 = vcombine.high %v610_v15, %v614_v16  ;;  %v626_v31 = vld [vmem:[%s2748_s3 + $0x190] sm:$0xff]  ;;  %v635_v41 = vld [vmem:[%s2748_s3 + $0x1d8] sm:$0xff] }
 0x122   :  { %v566_v45 = vadd.f32 %v559_v32, %v550_v39  ;;  %v552_v46 = vmax.f32 %v544_v22, %v548_v40  ;;  %v1776_v22 = vcombine.high %v611_v17, %v615_v18  ;;  %v1773_v27 = vcombine.low %v610_v15, %v614_v16  ;;  %v634_v39 = vld [vmem:[%s2748_s3 + $0x1d0] sm:$0xff]  ;;  %v639_v42 = vld [vmem:[%s2748_s3 + $0x1f8] sm:$0xff] }
 0x123   :  { %v567_v47 = vadd.f32 %v563_v36, %v551_v43  ;;  %v553_v48 = vmax.f32 %v545_v25, %v549_v44  ;;  %v619_v25 = vld [vmem:[%s2748_s3 + $0x158] sm:$0xff]  ;;  %v1781_v35 = vcombine.low %v618_v23, %v622_v24  ;;  %v1792_v38 = vcombine.high %v627_v33, %v631_v34  ;;  %v638_v40 = vld [vmem:[%s2748_s3 + $0x1f0] sm:$0xff] }
 0x124   :  { %v568_v49 = vadd.f32 %v559_v32, %v552_v46  ;;  %v570_v51 = vmax.f32 %v566_v45, 0.0  ;;  %v1784_v30 = vcombine.high %v619_v25, %v623_v26  ;;  %v630_v32 = vld [vmem:[%s2748_s3 + $0x1b0] sm:$0xff]  ;;  %v1791_v44 = vcombine.low %v627_v33, %v631_v34  ;;  %v675_v18 = vld [vmem:[%s2748_s3 + $0x318] sm:$0xff] }
 0x125   :  { %v569_v50 = vadd.f32 %v563_v36, %v553_v48  ;;  %v571_v53 = vmax.f32 %v567_v47, 0.0  ;;  %v1783_v36 = vcombine.low %v619_v25, %v623_v26  ;;  %v1790_v37 = vcombine.high %v626_v31, %v630_v32  ;;  %v642_v47 = vld [vmem:[%s2748_s3 + $0x210] sm:$0xff]  ;;  %v683_v26 = vld [vmem:[%s2748_s3 + $0x358] sm:$0xff] }
 0x126   :  { %v572_v52 = vmax.f32 %v568_v49, 0.0  ;;  %v1789_v43 = vcombine.low %v626_v31, %v630_v32  ;;  %v1798_v45 = vcombine.high %v634_v39, %v638_v40  ;;  %v1800_v46 = vcombine.high %v635_v41, %v639_v42  ;;  %v646_v48 = vld [vmem:[%s2748_s3 + $0x230] sm:$0xff]  ;;  %v643_v49 = vld [vmem:[%s2748_s3 + $0x218] sm:$0xff] }
 0x127   :  { %v573_v54 = vmax.f32 %v569_v50, 0.0  ;;  %v647_v50 = vld [vmem:[%s2748_s3 + $0x238] sm:$0xff]  ;;  %v674_v16 = vld [vmem:[%s2748_s3 + $0x310] sm:$0xff] }
 0x128   :  { %v2514_v56 = vpack.c.bf16 %v572_v52, %v570_v51  ;;  %v1797_v51 = vcombine.low %v634_v39, %v638_v40  ;;  %v1799_v52 = vcombine.low %v635_v41, %v639_v42  ;;  %v1807_v61 = vcombine.low %v643_v49, %v647_v50  ;;  %v678_v17 = vld [vmem:[%s2748_s3 + $0x330] sm:$0xff]  ;;  %v691_v34 = vld [vmem:[%s2748_s3 + $0x398] sm:$0xff] }
 0x129   :  { %v575_v60 = vpack.c.bf16 %v573_v54, %v571_v53  ;;  %v1806_v53 = vcombine.high %v642_v47, %v646_v48  ;;  %v1808_v54 = vcombine.high %v643_v49, %v647_v50  ;;  %v682_v24 = vld [vmem:[%s2748_s3 + $0x350] sm:$0xff]  ;;  %v699_v42 = vld [vmem:[%s2748_s3 + $0x3d8] sm:$0xff]  ;;  %v2009_v50 = vld [vmem:[%s2750_s5] sm:$0xff]  }
 0x12a   :  { %v686_v25 = vld [vmem:[%s2748_s3 + $0x370] sm:$0xff] }
 0x12b   :  { %1376 = vmatprep.mubr.bf16.mxu0 %v575_v60  ;;  %1417 = vmatprep.mubr.bf16.mxu1 %v575_v60  ;;  %v690_v32 = vld [vmem:[%s2748_s3 + $0x390] sm:$0xff] }
 0x12c   :  { %1377 = vmatmul.mubr.bf16.vlgmr.msra.gmra.mrb[8].mxu0 %v2514_v56  ;;  %1418 = vmatmul.mubr.bf16.vlgmr.msra.gmra.mrb[8].mxu1 %v2514_v56  ;;  %v694_v33 = vld [vmem:[%s2748_s3 + $0x3b0] sm:$0xff] }
 0x12d   :  { %1427 = vmatpush1.bf16.msra.mxu0 %v1741_v9  ;;  %1468 = vmatpush1.bf16.msra.mxu1 %v1743_v10  ;;  %v1759_v9 = vcombine.low %v595_v1, %v599_v2  ;;  %v1766_v10 = vcombine.high %v602_v13, %v606_v4  ;;  %v662_v1 = vld [vmem:[%s2748_s3 + $0x2b0] sm:$0xff]  ;;  %v659_v2 = vld [vmem:[%s2748_s3 + $0x298] sm:$0xff] }
 0x12e   :  { %1458 = vmatprep.mubr.bf16.mxu0 %v575_v60  ;;  %1499 = vmatprep.mubr.bf16.mxu1 %v575_v60  ;;  %v1805_v60 = vcombine.low %v642_v47, %v646_v48  ;;  %v666_v4 = vld [vmem:[%s2748_s3 + $0x2d0] sm:$0xff] }
 0x12f   :  { %1428 = vmatprep.subr.bf16.mxu0 %v1750_v62  ;;  %1469 = vmatprep.subr.bf16.mxu1 %v1752_v63  ;;  %v1814_v62 = vcombine.high %v650_v55, %v654_v57  ;;  %v1816_v63 = vcombine.high %v651_v58, %v655_v59  ;;  %v698_v40 = vld [vmem:[%s2748_s3 + $0x3d0] sm:$0xff] }
 0x130   :  { %v702_v41 = vld [vmem:[%s2748_s3 + $0x3f0] sm:$0xff] }
 0x131   :  { %1429 = vmatpush1.bf16.msra.mxu0 %v1749_v3  ;;  %1470 = vmatpush1.bf16.msra.mxu1 %v1751_v7  ;;  %v663_v3 = vld [vmem:[%s2748_s3 + $0x2b8] sm:$0xff]  ;;  %v1813_v7 = vcombine.low %v650_v55, %v654_v57  ;;  %v1861_v48 = vcombine.low %v698_v40, %v702_v41  ;;  %v2014_v55 = vld [vmem:[%s2750_s5 + $0x28] sm:$0xff]   ;;  %v2015_v57 = vld [vmem:[%s2750_s5 + $0x30] sm:$0xff]  }
 0x132   :  { %1430 = vmatprep.subr.bf16.mxu0 %v1758_v11  ;;  %1471 = vmatprep.subr.bf16.mxu1 %v1760_v12  ;;  %v1815_v11 = vcombine.low %v651_v58, %v655_v59  ;;  %v1822_v12 = vcombine.high %v658_v0, %v662_v1  ;;  %v1824_v13 = vcombine.high %v659_v2, %v663_v3  ;;  %v2016_v58 = vld [vmem:[%s2750_s5 + $0x38] sm:$0xff]  }
 0x135   :  { %1431 = vmatpush1.bf16.msra.mxu0 %v1757_v8  ;;  %1472 = vmatpush1.bf16.msra.mxu1 %v1759_v9  ;;  %v671_v8 = vld [vmem:[%s2748_s3 + $0x2f8] sm:$0xff]  ;;  %v1821_v9 = vcombine.low %v658_v0, %v662_v1 }
 0x136   :  { %1432 = vmatprep.subr.bf16.mxu0 %v1766_v10  ;;  %1473 = vmatprep.subr.bf16.mxu1 %v1768_v14  ;;  %v1823_v10 = vcombine.low %v659_v2, %v663_v3  ;;  %v1830_v14 = vcombine.high %v666_v4, %v670_v5  ;;  %v1832_v15 = vcombine.high %v667_v6, %v671_v8 }
 0x139   :  { %1433 = vmatpush1.bf16.msra.mxu0 %v1765_v19  ;;  %1474 = vmatpush1.bf16.msra.mxu1 %v1767_v20  ;;  %v679_v19 = vld [vmem:[%s2748_s3 + $0x338] sm:$0xff]  ;;  %v1829_v20 = vcombine.low %v666_v4, %v670_v5 }
 0x13a   :  { %1434 = vmatprep.subr.bf16.mxu0 %v1774_v21  ;;  %1475 = vmatprep.subr.bf16.mxu1 %v1776_v22  ;;  %v1831_v21 = vcombine.low %v667_v6, %v671_v8  ;;  %v1838_v22 = vcombine.high %v674_v16, %v678_v17  ;;  %v1840_v23 = vcombine.high %v675_v18, %v679_v19 }
 0x13d   :  { %1435 = vmatpush1.bf16.msra.mxu0 %v1773_v27  ;;  %1476 = vmatpush1.bf16.msra.mxu1 %v1775_v28  ;;  %v687_v27 = vld [vmem:[%s2748_s3 + $0x378] sm:$0xff]  ;;  %v1837_v28 = vcombine.low %v674_v16, %v678_v17 }
 0x13e   :  { %1436 = vmatprep.subr.bf16.mxu0 %v1782_v29  ;;  %1477 = vmatprep.subr.bf16.mxu1 %v1784_v30  ;;  %v1839_v29 = vcombine.low %v675_v18, %v679_v19  ;;  %v1846_v30 = vcombine.high %v682_v24, %v686_v25  ;;  %v1848_v31 = vcombine.high %v683_v26, %v687_v27 }
 0x141   :  { %1437 = vmatpush1.bf16.msra.mxu0 %v1781_v35  ;;  %1478 = vmatpush1.bf16.msra.mxu1 %v1783_v36  ;;  %v695_v35 = vld [vmem:[%s2748_s3 + $0x3b8] sm:$0xff]  ;;  %v1845_v36 = vcombine.low %v682_v24, %v686_v25 }
 0x142   :  { %1438 = vmatprep.subr.bf16.mxu0 %v1790_v37  ;;  %1479 = vmatprep.subr.bf16.mxu1 %v1792_v38  ;;  %v1847_v37 = vcombine.low %v683_v26, %v687_v27  ;;  %v1854_v38 = vcombine.high %v690_v32, %v694_v33  ;;  %v1856_v39 = vcombine.high %v691_v34, %v695_v35 }
 0x145   :  { %1439 = vmatpush1.bf16.msra.mxu0 %v1789_v43  ;;  %1480 = vmatpush1.bf16.msra.mxu1 %v1791_v44  ;;  %v703_v43 = vld [vmem:[%s2748_s3 + $0x3f8] sm:$0xff]  ;;  %v1853_v44 = vcombine.low %v690_v32, %v694_v33 }
 0x146   :  { %1440 = vmatprep.subr.bf16.mxu0 %v1798_v45  ;;  %1481 = vmatprep.subr.bf16.mxu1 %v1800_v46  ;;  %v1855_v45 = vcombine.low %v691_v34, %v695_v35  ;;  %v1862_v46 = vcombine.high %v698_v40, %v702_v41  ;;  %v1864_v47 = vcombine.high %v699_v42, %v703_v43 }
 0x147   :  { %v1863_v49 = vcombine.low %v699_v42, %v703_v43 }
 0x149   :  { %1441 = vmatpush1.bf16.msra.mxu0 %v1797_v51  ;;  %1482 = vmatpush1.bf16.msra.mxu1 %v1799_v52  ;;  %v2041_v51 = vmov 0.0   ;;  %v2010_v52 = vld [vmem:[%s2750_s5 + $0x8] sm:$0xff]  }
 0x14a   :  { %1442 = vmatprep.subr.bf16.mxu0 %v1806_v53  ;;  %1483 = vmatprep.subr.bf16.mxu1 %v1808_v54  ;;  %v2011_v53 = vld [vmem:[%s2750_s5 + $0x10] sm:$0xff]   ;;  %v2013_v54 = vld [vmem:[%s2750_s5 + $0x20] sm:$0xff]  }
 0x14d   :  { %1443 = vmatpush1.bf16.msra.mxu0 %v1805_v60  ;;  %1484 = vmatpush1.bf16.msra.mxu1 %v1807_v61 }
 0x14e   :  { %1444 = vmatprep.subr.bf16.mxu0 %v1814_v62  ;;  %1485 = vmatprep.subr.bf16.mxu1 %v1816_v63 }
 0x151   :  { %1445 = vmatpush1.bf16.msra.mxu0 %v1813_v7  ;;  %1486 = vmatpush1.bf16.msra.mxu1 %v1815_v11 }
 0x152   :  { %1446 = vmatprep.subr.bf16.mxu0 %v1822_v12  ;;  %1487 = vmatprep.subr.bf16.mxu1 %v1824_v13 }
 0x155   :  { %1447 = vmatpush1.bf16.msra.mxu0 %v1821_v9  ;;  %1488 = vmatpush1.bf16.msra.mxu1 %v1823_v10 }
 0x156   :  { %1448 = vmatprep.subr.bf16.mxu0 %v1830_v14  ;;  %1489 = vmatprep.subr.bf16.mxu1 %v1832_v15 }
 0x159   :  { %1449 = vmatpush1.bf16.msra.mxu0 %v1829_v20  ;;  %1490 = vmatpush1.bf16.msra.mxu1 %v1831_v21 }
 0x15a   :  { %1450 = vmatprep.subr.bf16.mxu0 %v1838_v22  ;;  %1491 = vmatprep.subr.bf16.mxu1 %v1840_v23  ;;  %v1865_v23 = vld [vmem:[%s2749_s4] ss:$0 sm:$0xff] }
 0x15d   :  { %1451 = vmatpush1.bf16.msra.mxu0 %v1837_v28  ;;  %1492 = vmatpush1.bf16.msra.mxu1 %v1839_v29  ;;  %v1866_v28 = vld [vmem:[%s2751_s6] ss:$0 sm:$0xff] }
 0x15e   :  { %1452 = vmatprep.subr.bf16.mxu0 %v1846_v30  ;;  %1493 = vmatprep.subr.bf16.mxu1 %v1848_v31 }
 0x161   :  { %1453 = vmatpush1.bf16.msra.mxu0 %v1845_v36  ;;  %1494 = vmatpush1.bf16.msra.mxu1 %v1847_v37 }
 0x162   :  { %1454 = vmatprep.subr.bf16.mxu0 %v1854_v38  ;;  %1495 = vmatprep.subr.bf16.mxu1 %v1856_v39 }
 0x165   :  { %1455 = vmatpush1.bf16.msra.mxu0 %v1853_v44  ;;  %1496 = vmatpush1.bf16.msra.mxu1 %v1855_v45 }
 0x166   :  { %1456 = vmatprep.subr.bf16.mxu0 %v1862_v46  ;;  %1497 = vmatprep.subr.bf16.mxu1 %v1864_v47 }
 0x169   :  { %1457 = vmatpush1.bf16.msra.mxu0 %v1861_v48  ;;  %1498 = vmatpush1.bf16.msra.mxu1 %v1863_v49 }
 0x16a   :  { %1884 = vmatprep.subr.bf16.mxu0 %v2041_v51 }
 0x16c   :  { %1459 = vmatmul.mubr.bf16.vlgmr.msra.gmra.mrb[12].mxu0 %v2514_v56  ;;  %1500 = vmatmul.mubr.bf16.vlgmr.msra.gmra.mrb[12].mxu1 %v2514_v56  ;;  %v2012_v56 = vld [vmem:[%s2750_s5 + $0x18] sm:$0xff]  }
 0x16d   :  { %1885 = vmatpush3.bf16.msra.mxu0 %v2009_v50  ;;  %1900 = vmatprep.mubr.msk.bf16.mxu0 %vm2042_vm0, %v2041_v51 }
 0x16e   :  { %1886 = vmatprep.subr.bf16.mxu0 %v2041_v51 }
 0x171   :  { %1887 = vmatpush3.bf16.msra.mxu0 %v2010_v52 }
 0x172   :  { %1888 = vmatprep.subr.bf16.mxu0 %v2041_v51 }
 0x175   :  { %1889 = vmatpush3.bf16.msra.mxu0 %v2011_v53 }
 0x176   :  { %1890 = vmatprep.subr.bf16.mxu0 %v2041_v51 }
 0x179   :  { %1891 = vmatpush3.bf16.msra.mxu0 %v2012_v56 }
 0x17a   :  { %1892 = vmatprep.subr.bf16.mxu0 %v2041_v51 }
 0x17d   :  { %1893 = vmatpush3.bf16.msra.mxu0 %v2013_v54 }
 0x17e   :  { %1894 = vmatprep.subr.bf16.mxu0 %v2041_v51 }
 0x181   :  { %1895 = vmatpush3.bf16.msra.mxu0 %v2014_v55 }
 0x182   :  { %1896 = vmatprep.subr.bf16.mxu0 %v2041_v51 }
 0x185   :  { %1897 = vmatpush3.bf16.msra.mxu0 %v2015_v57 }
 0x186   :  { %1898 = vmatprep.subr.bf16.mxu0 %v2041_v51 }
 0x189   :  { %1899 = vmatpush3.bf16.msra.mxu0 %v2016_v58 }
 0x1ff   :  { %v1378_v59 = vpop.f32.mrb[8].mxu0  ;;  %v1419_v60 = vpop.f32.mrb[8].mxu1 }
 0x200   :  { %v1380_v61 = vpop.f32.mrb[9].mxu0  ;;  %v1421_v62 = vpop.f32.mrb[9].mxu1  ;;  %v1513_v7 = vrot.slane %v1419_v60, 4 }
 0x201   :  { %v1509_v63 = vrot.slane %v1380_v61, 2  ;;  %v1382_v0 = vpop.f32.mrb[10].mxu0  ;;  %v1423_v1 = vpop.f32.mrb[10].mxu1  ;;  %v1517_v12 = vrot.slane %v1421_v62, 6 }
 0x202   :  { %v1383_v2 = vpop.f32.mrb[11].mxu0  ;;  %v1424_v3 = vpop.f32.mrb[11].mxu1 }
 0x203   :  { %v1511_v11 = vadd.f32 %v1509_v63, %v1378_v59 }
 0x205   :  { %v1515_v13 = vadd.f32 %v1513_v7, %v1511_v11 }
 0x207   :  { %v1519_v4 = vadd.f32 %v1517_v12, %v1515_v13 }
 0x23f   :  { %v1460_v5 = vpop.f32.mrb[12].mxu0  ;;  %v1501_v6 = vpop.f32.mrb[12].mxu1 }
 0x240   :  { %v1461_v8 = vpop.f32.mrb[13].mxu0  ;;  %v1502_v9 = vpop.f32.mrb[13].mxu1 }
 0x241   :  { %v1462_v10 = vpop.f32.mrb[14].mxu0  ;;  %v1503_v14 = vpop.f32.mrb[14].mxu1 }
 0x242   :  { %v1520_v15 = vadd.f32 %v1519_v4, %v1462_v10  ;;  %v1464_v16 = vpop.f32.mrb[15].mxu0  ;;  %v1505_v17 = vpop.f32.mrb[15].mxu1  ;;  %v1526_v19 = vrot.slane %v1503_v14, 4 }
 0x243   :  { %v1522_v18 = vrot.slane %v1464_v16, 2  ;;  %v1530_v22 = vrot.slane %v1505_v17, 6 }
 0x245   :  { %v1524_v20 = vadd.f32 %v1522_v18, %v1520_v15 }
 0x247   :  { %v1528_v21 = vadd.f32 %v1526_v19, %v1524_v20 }
 0x249   :  { %v1532_v24 = vadd.f32 %v1530_v22, %v1528_v21 }
 0x24b   :  { %v1540_v25 = vadd.f32 %v1865_v23, %v1532_v24 }
 0x24d   :  { %v1541_v26 = vmax.f32 %v1540_v25, 0.0 }
 0x24f   :  { %v1542_v27 = vpack.c.bf16 %v1541_v26, %v1541_v26 }
 0x251   :  { %1901 = vmatmul.mubr.bf16.vlgmr.msra.gmra.mrb[16].mxu0 %v1542_v27 }
 0x324   :  { %v1648_v29 = vpop.f32.mrb[16].mxu0 }
 0x325   :  { %v1649_v30 = vadd.f32 %v1866_v28, %v1648_v29  ;;  %v1902_v31 = vpop.f32.mrb[17].mxu0 }
 0x326   :  { %v1651_v32 = vpop.f32.mrb[18].mxu0 }
 0x327   :  { %1654 = vst [vmem:[#allocation2] sm:$0x3] %v1649_v30  ;;  %v1903_v33 = vpop.f32.mrb[19].mxu0 }
 0x328   :  { %2028 = shalt.err (!%p2025_p4)
}
 0x329   :  { %s2029_s6 = scalar_lea.hbm %s2752_s7, 32 }
 0x32a   :  { %p2030_p5 = scmp.ne.s32.totalorder %s2752_s7, %s2029_s6  ;;  %p2033_p6 = scmp.lt.u32.totalorder %s2029_s6, %s2752_s7 }
 0x32c   :  { %p2035_p7 = pnand %p2033_p6, %p2030_p5 }
 0x32e   :  { %2038 = shalt.err (!%p2035_p7)
}
 0x32f   :  { %1664 = dma.vmem_to_hbm [thread:$0]  %s1662_s19, 32, %s2752_s7, [#allocation3]  }
 0x330   :  { %2039 = dma.done.wait [#allocation3], 32  }
 0x331   :  { %2040 = vsyncadd [#allocation3], 4294967264 }
 0x332   :  { %1668 = vsyncpa [#allocation3], 1 }

</bundles_post_ra>
